<compile_context>
chip_gen: v7x
topology: tpu7x:2x2x1
jax: 0.10.0
libtpu: 0.0.40
codegen_flags: <defaults>
</compile_context>

<pallas_src>
import math

import jax
import jax.numpy as jnp
from jax import lax
from jax.experimental import pallas as pl
from jax.experimental.pallas import tpu as pltpu


def mh_attn_kernel(x_ref, wqkv_ref, wz_ref, bz_ref, o_ref):
    """One batch element of fused multi-head self-attention.

    x_ref    : (1, S, D)      input block for this batch element
    wqkv_ref : (D, 3*H*D)     fused [Wq_heads | Wk_heads | Wv_heads]^T
    wz_ref   : (H*D, D)       Wz^T (output projection over concatenated heads)
    bz_ref   : (1, D)         Wz bias
    o_ref    : (1, S, D)      output block
    """
    x = x_ref[0]                                   # (S, D)
    D = x.shape[-1]
    HD = wz_ref.shape[0]                           # H * D
    H = HD // D

    # One fused QKV projection: a single MXU push instead of 3*H tiny K=32 matmuls.
    qkv = jnp.dot(x, wqkv_ref[...], preferred_element_type=jnp.float32)   # (S, 3*H*D)

    # (q / D^0.25) @ (k / D^0.25)^T == (q @ k^T) / sqrt(D): scale once on the scores.
    inv_sqrt_d = 1.0 / (float(D) ** 0.5)

    z_heads = []
    for h in range(H):                             # static unroll; H is small (4)
        q_h = qkv[:, h * D:(h + 1) * D]
        k_h = qkv[:, HD + h * D:HD + (h + 1) * D]
        v_h = qkv[:, 2 * HD + h * D:2 * HD + (h + 1) * D]

        # q @ k^T without materializing a transpose (contract last dim of both).
        s = lax.dot_general(q_h, k_h, (((1,), (1,)), ((), ())),
                            preferred_element_type=jnp.float32) * inv_sqrt_d     # (S, S)
        s = s - jnp.max(s, axis=-1, keepdims=True)
        p = jnp.exp(s)
        # EUP approximate reciprocal: its own VLIW slot, effectively free next to the exp.
        attn = p * pl.reciprocal(jnp.sum(p, axis=-1, keepdims=True), approx=True)
        z_heads.append(jnp.dot(attn, v_h, preferred_element_type=jnp.float32))   # (S, D)

    # Concat over heads then one fused output projection (128-deep contraction).
    z_cat = jnp.concatenate(z_heads, axis=-1)                                     # (S, H*D)
    out = jnp.dot(z_cat, wz_ref[...], preferred_element_type=jnp.float32) + bz_ref[...]

    # NOTE: output last dim is D=32 (<128 lanes) -> masked vst; at S=8 that is ~8 partial
    # stores and not worth the cross-lane relayout a lane-dense (1, S*D) output would need.
    o_ref[0] = out.astype(o_ref.dtype)


def mh_self_attention(x, wq_t, wk_t, wv_t, wz_t, bz):
    """x: (B, S, D); wq_t/wk_t/wv_t/wz_t: (H, D, D) pre-transposed per head; bz: (1, D)."""
    B, S, D = x.shape
    H = wq_t.shape[0]
    HD = H * D

    # Fuse per-head weights in the wrapper (plain XLA ops, outside the kernel):
    #   columns [0:HD)    -> [Wq_0^T | ... | Wq_{H-1}^T]
    #   columns [HD:2HD)  -> [Wk_0^T | ...]
    #   columns [2HD:3HD) -> [Wv_0^T | ...]
    wq_all = jnp.transpose(wq_t, (1, 0, 2)).reshape(D, HD)
    wk_all = jnp.transpose(wk_t, (1, 0, 2)).reshape(D, HD)
    wv_all = jnp.transpose(wv_t, (1, 0, 2)).reshape(D, HD)
    w_qkv_t = jnp.concatenate([wq_all, wk_all, wv_all], axis=1)    # (D, 3*H*D)
    wz_full = wz_t.reshape(HD, D)                                  # (H*D, D) == concat over heads

    return pl.pallas_call(
        mh_attn_kernel,
        out_shape=jax.ShapeDtypeStruct((B, S, D), x.dtype),
        grid_spec=pltpu.PrefetchScalarGridSpec(
            num_scalar_prefetch=0,
            grid=(B,),
            in_specs=[
                pl.BlockSpec((1, S, D), lambda b: (b, 0, 0)),
                # Constant block indices across the grid -> ~64 KB of weights DMA'd once
                # and kept resident in VMEM for every batch element.
                pl.BlockSpec((D, 3 * HD), lambda b: (0, 0)),
                pl.BlockSpec((HD, D), lambda b: (0, 0)),
                pl.BlockSpec((1, D), lambda b: (0, 0)),
            ],
            out_specs=pl.BlockSpec((1, S, D), lambda b: (b, 0, 0)),
        ),
        compiler_params=pltpu.CompilerParams(
            dimension_semantics=("parallel",),     # batch across TensorCores (v7x megacore)
        ),
    )(x, w_qkv_t, wz_full, bz)


def mh_self_attention_ref(x, wq_t, wk_t, wv_t, wz_t, bz):
    """Plain-JAX reference matching the PyTorch forward exactly."""
    D = x.shape[-1]
    scale = 1.0 / (float(D) ** 0.25)
    zs = []
    for h in range(wq_t.shape[0]):
        q = (x @ wq_t[h]) * scale
        k = (x @ wk_t[h]) * scale
        v = x @ wv_t[h]
        attn = jax.nn.softmax(jnp.einsum("bqd,bkd->bqk", q, k), axis=-1)
        zs.append(jnp.einsum("bqk,bkd->bqd", attn, v))
    zcat = jnp.concatenate(zs, axis=-1)                                         # (B, S, H*D)
    wz_full = jnp.concatenate([wz_t[h] for h in range(wz_t.shape[0])], axis=0)  # (H*D, D)
    return zcat @ wz_full + bz[0]


if __name__ == "__main__":
    B, S, D, H = 2, 8, 32, 4   # batch, seq (similarity-type vector length), input_size, heads

    key = jax.random.PRNGKey(0)
    kx, kq, kk, kv, kz, kb = jax.random.split(key, 6)

    bound = 1.0 / math.sqrt(D)
    x = jax.random.normal(kx, (B, S, D), dtype=jnp.float32)
    # Per-head Wq/Wk/Wv (no bias), stored pre-transposed: (H, D_in, D_out).
    wq_t = jax.random.uniform(kq, (H, D, D), jnp.float32, -bound, bound)
    wk_t = jax.random.uniform(kk, (H, D, D), jnp.float32, -bound, bound)
    wv_t = jax.random.uniform(kv, (H, D, D), jnp.float32, -bound, bound)
    # Wz: Linear(H*D -> D) with bias; stored as per-head (D, D) slices of Wz^T.
    bound_z = 1.0 / math.sqrt(H * D)
    wz_t = jax.random.uniform(kz, (H, D, D), jnp.float32, -bound_z, bound_z)
    bz = jax.random.uniform(kb, (1, D), jnp.float32, -bound_z, bound_z)

    out = mh_self_attention(x, wq_t, wk_t, wv_t, wz_t, bz)
    out = jax.block_until_ready(out)

    ref = mh_self_attention_ref(x, wq_t, wk_t, wv_t, wz_t, bz)
    assert out.shape == (B, S, D)
    # Tolerance loosened slightly vs exact math because the softmax denominator uses the
    # EUP approximate reciprocal (pl.reciprocal(approx=True)).
    assert jnp.allclose(out, ref, atol=1e-3, rtol=1e-3), "mismatch vs reference"

    print("KERNEL_OK")
</pallas_src>

<mosaic_0001>
module attributes {stable_mosaic.version = 11 : i64} {
  func.func @mh_attn_kernel(%arg0: i32, %arg1: memref<1x8x32xf32, #tpu.memory_space<vmem>>, %arg2: memref<32x384xf32, #tpu.memory_space<vmem>>, %arg3: memref<128x32xf32, #tpu.memory_space<vmem>>, %arg4: memref<1x32xf32, #tpu.memory_space<vmem>>, %arg5: memref<1x8x32xf32, #tpu.memory_space<vmem>>) attributes {dimension_semantics = [#tpu.dimension_semantics<parallel>], iteration_bounds = array<i64: 2>, scalar_prefetch = 0 : i64, scratch_operands = 0 : i64, tpu.core_type = #tpu.core_type<tc>, window_params = [{transform_indices = @transform_0, window_bounds = array<i64: 1, 8, 32>}, {pipeline_mode = #tpu.pipeline_mode<synchronous>, transform_indices = @transform_1, window_bounds = array<i64: 32, 384>}, {pipeline_mode = #tpu.pipeline_mode<synchronous>, transform_indices = @transform_2, window_bounds = array<i64: 128, 32>}, {pipeline_mode = #tpu.pipeline_mode<synchronous>, transform_indices = @transform_3, window_bounds = array<i64: 1, 32>}, {transform_indices = @transform_4, window_bounds = array<i64: 1, 8, 32>}]} {
    %c0 = arith.constant 0 : index
    %c0_0 = arith.constant 0 : index
    %c0_1 = arith.constant 0 : index
    %0 = vector.load %arg1[%c0, %c0_0, %c0_1] : memref<1x8x32xf32, #tpu.memory_space<vmem>>, vector<1x8x32xf32>
    %1 = vector.shape_cast %0 : vector<1x8x32xf32> to vector<8x32xf32>
    %c0_2 = arith.constant 0 : index
    %c0_3 = arith.constant 0 : index
    %2 = vector.load %arg2[%c0_2, %c0_3] : memref<32x384xf32, #tpu.memory_space<vmem>>, vector<32x384xf32>
    %cst = arith.constant dense<0.000000e+00> : vector<8x384xf32>
    %3 = tpu.matmul %1, %2, %cst {dimension_numbers = #tpu.dot_dimension_numbers<[1], [0], [0], [1], [0, 0, 1, 1], [], []>} : vector<8x32xf32>, vector<32x384xf32>, vector<8x384xf32> -> vector<8x384xf32>
    %4 = vector.extract_strided_slice %3 {offsets = [0, 0], sizes = [8, 32], strides = [1, 1]} : vector<8x384xf32> to vector<8x32xf32>
    %5 = vector.extract_strided_slice %3 {offsets = [0, 128], sizes = [8, 32], strides = [1, 1]} : vector<8x384xf32> to vector<8x32xf32>
    %6 = vector.extract_strided_slice %3 {offsets = [0, 256], sizes = [8, 32], strides = [1, 1]} : vector<8x384xf32> to vector<8x32xf32>
    %cst_4 = arith.constant dense<0.000000e+00> : vector<8x8xf32>
    %7 = tpu.matmul %4, %5, %cst_4 {dimension_numbers = #tpu.dot_dimension_numbers<[1], [1], [0], [0], [0, 0, 1, 0], [], []>} : vector<8x32xf32>, vector<8x32xf32>, vector<8x8xf32> -> vector<8x8xf32>
    %cst_5 = arith.constant 0.176776692 : f32
    %8 = vector.broadcast %cst_5 : f32 to vector<8x8xf32>
    %9 = arith.mulf %7, %8 : vector<8x8xf32>
    %cst_6 = arith.constant dense<0xFF800000> : vector<8xf32>
    %10 = vector.multi_reduction <maximumf>, %9, %cst_6 [1] : vector<8x8xf32> to vector<8xf32>
    %11 = vector.shape_cast %10 : vector<8xf32> to vector<8x1xf32>
    %12 = vector.broadcast %11 : vector<8x1xf32> to vector<8x8xf32>
    %13 = arith.subf %9, %12 : vector<8x8xf32>
    %14 = math.exp %13 : vector<8x8xf32>
    %cst_7 = arith.constant dense<0.000000e+00> : vector<8xf32>
    %15 = vector.multi_reduction <add>, %14, %cst_7 [1] : vector<8x8xf32> to vector<8xf32>
    %16 = vector.shape_cast %15 : vector<8xf32> to vector<8x1xf32>
    %17 = tpu.reciprocal %16 {approx = true} : vector<8x1xf32> -> vector<8x1xf32>
    %18 = vector.broadcast %17 : vector<8x1xf32> to vector<8x8xf32>
    %19 = arith.mulf %14, %18 : vector<8x8xf32>
    %cst_8 = arith.constant dense<0.000000e+00> : vector<8x32xf32>
    %20 = tpu.matmul %19, %6, %cst_8 {dimension_numbers = #tpu.dot_dimension_numbers<[1], [0], [0], [1], [0, 0, 1, 1], [], []>} : vector<8x8xf32>, vector<8x32xf32>, vector<8x32xf32> -> vector<8x32xf32>
    %21 = vector.extract_strided_slice %3 {offsets = [0, 32], sizes = [8, 32], strides = [1, 1]} : vector<8x384xf32> to vector<8x32xf32>
    %22 = vector.extract_strided_slice %3 {offsets = [0, 160], sizes = [8, 32], strides = [1, 1]} : vector<8x384xf32> to vector<8x32xf32>
    %23 = vector.extract_strided_slice %3 {offsets = [0, 288], sizes = [8, 32], strides = [1, 1]} : vector<8x384xf32> to vector<8x32xf32>
    %cst_9 = arith.constant dense<0.000000e+00> : vector<8x8xf32>
    %24 = tpu.matmul %21, %22, %cst_9 {dimension_numbers = #tpu.dot_dimension_numbers<[1], [1], [0], [0], [0, 0, 1, 0], [], []>} : vector<8x32xf32>, vector<8x32xf32>, vector<8x8xf32> -> vector<8x8xf32>
    %cst_10 = arith.constant 0.176776692 : f32
    %25 = vector.broadcast %cst_10 : f32 to vector<8x8xf32>
    %26 = arith.mulf %24, %25 : vector<8x8xf32>
    %cst_11 = arith.constant dense<0xFF800000> : vector<8xf32>
    %27 = vector.multi_reduction <maximumf>, %26, %cst_11 [1] : vector<8x8xf32> to vector<8xf32>
    %28 = vector.shape_cast %27 : vector<8xf32> to vector<8x1xf32>
    %29 = vector.broadcast %28 : vector<8x1xf32> to vector<8x8xf32>
    %30 = arith.subf %26, %29 : vector<8x8xf32>
    %31 = math.exp %30 : vector<8x8xf32>
    %cst_12 = arith.constant dense<0.000000e+00> : vector<8xf32>
    %32 = vector.multi_reduction <add>, %31, %cst_12 [1] : vector<8x8xf32> to vector<8xf32>
    %33 = vector.shape_cast %32 : vector<8xf32> to vector<8x1xf32>
    %34 = tpu.reciprocal %33 {approx = true} : vector<8x1xf32> -> vector<8x1xf32>
    %35 = vector.broadcast %34 : vector<8x1xf32> to vector<8x8xf32>
    %36 = arith.mulf %31, %35 : vector<8x8xf32>
    %cst_13 = arith.constant dense<0.000000e+00> : vector<8x32xf32>
    %37 = tpu.matmul %36, %23, %cst_13 {dimension_numbers = #tpu.dot_dimension_numbers<[1], [0], [0], [1], [0, 0, 1, 1], [], []>} : vector<8x8xf32>, vector<8x32xf32>, vector<8x32xf32> -> vector<8x32xf32>
    %38 = vector.extract_strided_slice %3 {offsets = [0, 64], sizes = [8, 32], strides = [1, 1]} : vector<8x384xf32> to vector<8x32xf32>
    %39 = vector.extract_strided_slice %3 {offsets = [0, 192], sizes = [8, 32], strides = [1, 1]} : vector<8x384xf32> to vector<8x32xf32>
    %40 = vector.extract_strided_slice %3 {offsets = [0, 320], sizes = [8, 32], strides = [1, 1]} : vector<8x384xf32> to vector<8x32xf32>
    %cst_14 = arith.constant dense<0.000000e+00> : vector<8x8xf32>
    %41 = tpu.matmul %38, %39, %cst_14 {dimension_numbers = #tpu.dot_dimension_numbers<[1], [1], [0], [0], [0, 0, 1, 0], [], []>} : vector<8x32xf32>, vector<8x32xf32>, vector<8x8xf32> -> vector<8x8xf32>
    %cst_15 = arith.constant 0.176776692 : f32
    %42 = vector.broadcast %cst_15 : f32 to vector<8x8xf32>
    %43 = arith.mulf %41, %42 : vector<8x8xf32>
    %cst_16 = arith.constant dense<0xFF800000> : vector<8xf32>
    %44 = vector.multi_reduction <maximumf>, %43, %cst_16 [1] : vector<8x8xf32> to vector<8xf32>
    %45 = vector.shape_cast %44 : vector<8xf32> to vector<8x1xf32>
    %46 = vector.broadcast %45 : vector<8x1xf32> to vector<8x8xf32>
    %47 = arith.subf %43, %46 : vector<8x8xf32>
    %48 = math.exp %47 : vector<8x8xf32>
    %cst_17 = arith.constant dense<0.000000e+00> : vector<8xf32>
    %49 = vector.multi_reduction <add>, %48, %cst_17 [1] : vector<8x8xf32> to vector<8xf32>
    %50 = vector.shape_cast %49 : vector<8xf32> to vector<8x1xf32>
    %51 = tpu.reciprocal %50 {approx = true} : vector<8x1xf32> -> vector<8x1xf32>
    %52 = vector.broadcast %51 : vector<8x1xf32> to vector<8x8xf32>
    %53 = arith.mulf %48, %52 : vector<8x8xf32>
    %cst_18 = arith.constant dense<0.000000e+00> : vector<8x32xf32>
    %54 = tpu.matmul %53, %40, %cst_18 {dimension_numbers = #tpu.dot_dimension_numbers<[1], [0], [0], [1], [0, 0, 1, 1], [], []>} : vector<8x8xf32>, vector<8x32xf32>, vector<8x32xf32> -> vector<8x32xf32>
    %55 = vector.extract_strided_slice %3 {offsets = [0, 96], sizes = [8, 32], strides = [1, 1]} : vector<8x384xf32> to vector<8x32xf32>
    %56 = vector.extract_strided_slice %3 {offsets = [0, 224], sizes = [8, 32], strides = [1, 1]} : vector<8x384xf32> to vector<8x32xf32>
    %57 = vector.extract_strided_slice %3 {offsets = [0, 352], sizes = [8, 32], strides = [1, 1]} : vector<8x384xf32> to vector<8x32xf32>
    %cst_19 = arith.constant dense<0.000000e+00> : vector<8x8xf32>
    %58 = tpu.matmul %55, %56, %cst_19 {dimension_numbers = #tpu.dot_dimension_numbers<[1], [1], [0], [0], [0, 0, 1, 0], [], []>} : vector<8x32xf32>, vector<8x32xf32>, vector<8x8xf32> -> vector<8x8xf32>
    %cst_20 = arith.constant 0.176776692 : f32
    %59 = vector.broadcast %cst_20 : f32 to vector<8x8xf32>
    %60 = arith.mulf %58, %59 : vector<8x8xf32>
    %cst_21 = arith.constant dense<0xFF800000> : vector<8xf32>
    %61 = vector.multi_reduction <maximumf>, %60, %cst_21 [1] : vector<8x8xf32> to vector<8xf32>
    %62 = vector.shape_cast %61 : vector<8xf32> to vector<8x1xf32>
    %63 = vector.broadcast %62 : vector<8x1xf32> to vector<8x8xf32>
    %64 = arith.subf %60, %63 : vector<8x8xf32>
    %65 = math.exp %64 : vector<8x8xf32>
    %cst_22 = arith.constant dense<0.000000e+00> : vector<8xf32>
    %66 = vector.multi_reduction <add>, %65, %cst_22 [1] : vector<8x8xf32> to vector<8xf32>
    %67 = vector.shape_cast %66 : vector<8xf32> to vector<8x1xf32>
    %68 = tpu.reciprocal %67 {approx = true} : vector<8x1xf32> -> vector<8x1xf32>
    %69 = vector.broadcast %68 : vector<8x1xf32> to vector<8x8xf32>
    %70 = arith.mulf %65, %69 : vector<8x8xf32>
    %cst_23 = arith.constant dense<0.000000e+00> : vector<8x32xf32>
    %71 = tpu.matmul %70, %57, %cst_23 {dimension_numbers = #tpu.dot_dimension_numbers<[1], [0], [0], [1], [0, 0, 1, 1], [], []>} : vector<8x8xf32>, vector<8x32xf32>, vector<8x32xf32> -> vector<8x32xf32>
    %72 = tpu.concatenate %20, %37, %54, %71 in 1 : vector<8x32xf32>, vector<8x32xf32>, vector<8x32xf32>, vector<8x32xf32> -> vector<8x128xf32>
    %c0_24 = arith.constant 0 : index
    %c0_25 = arith.constant 0 : index
    %73 = vector.load %arg3[%c0_24, %c0_25] : memref<128x32xf32, #tpu.memory_space<vmem>>, vector<128x32xf32>
    %cst_26 = arith.constant dense<0.000000e+00> : vector<8x32xf32>
    %74 = tpu.matmul %72, %73, %cst_26 {dimension_numbers = #tpu.dot_dimension_numbers<[1], [0], [0], [1], [0, 0, 1, 1], [], []>} : vector<8x128xf32>, vector<128x32xf32>, vector<8x32xf32> -> vector<8x32xf32>
    %c0_27 = arith.constant 0 : index
    %c0_28 = arith.constant 0 : index
    %75 = vector.load %arg4[%c0_27, %c0_28] : memref<1x32xf32, #tpu.memory_space<vmem>>, vector<1x32xf32>
    %76 = vector.broadcast %75 : vector<1x32xf32> to vector<8x32xf32>
    %77 = arith.addf %74, %76 : vector<8x32xf32>
    %c0_29 = arith.constant 0 : index
    %c0_30 = arith.constant 0 : index
    %c0_31 = arith.constant 0 : index
    %78 = vector.load %arg5[%c0_29, %c0_30, %c0_31] : memref<1x8x32xf32, #tpu.memory_space<vmem>>, vector<1x8x32xf32>
    %79 = vector.shape_cast %78 : vector<1x8x32xf32> to vector<8x32xf32>
    %80 = vector.shape_cast %77 : vector<8x32xf32> to vector<1x8x32xf32>
    tpu.vector_store %arg5[%c0_29, %c0_30, %c0_31], %80 {strides = array<i32>} : memref<1x8x32xf32, #tpu.memory_space<vmem>>, vector<1x8x32xf32>,
    return
  }
  func.func @transform_0(%arg0: i32) -> (i32, i32, i32) {
    %c0_i32 = arith.constant 0 : i32
    %c0_i32_0 = arith.constant 0 : i32
    %c0_i32_1 = arith.constant 0 : i32
    return %arg0, %c0_i32, %c0_i32_0 : i32, i32, i32
  }
  func.func @transform_1(%arg0: i32) -> (i32, i32) {
    %c0_i32 = arith.constant 0 : i32
    %c0_i32_0 = arith.constant 0 : i32
    %c0_i32_1 = arith.constant 0 : i32
    return %c0_i32, %c0_i32_0 : i32, i32
  }
  func.func @transform_2(%arg0: i32) -> (i32, i32) {
    %c0_i32 = arith.constant 0 : i32
    %c0_i32_0 = arith.constant 0 : i32
    %c0_i32_1 = arith.constant 0 : i32
    return %c0_i32, %c0_i32_0 : i32, i32
  }
  func.func @transform_3(%arg0: i32) -> (i32, i32) {
    %c0_i32 = arith.constant 0 : i32
    %c0_i32_0 = arith.constant 0 : i32
    %c0_i32_1 = arith.constant 0 : i32
    return %c0_i32, %c0_i32_0 : i32, i32
  }
  func.func @transform_4(%arg0: i32) -> (i32, i32, i32) {
    %c0_i32 = arith.constant 0 : i32
    %c0_i32_0 = arith.constant 0 : i32
    %c0_i32_1 = arith.constant 0 : i32
    return %arg0, %c0_i32, %c0_i32_0 : i32, i32, i32
  }
}

</mosaic_0001>

<bundles_post_ra>
// kernel: tpu_custom_call.1
= control target key start
LH: loop header
LB: loop body
LE: loop exit
PB: predicated region body
PF: predicated region fallthrough
CT: control target
= control target key end

     0   :  { %9 = vsyncpa [#allocation3], 0  ;;  %s1811_s0 = inlined_call_operand.vmem [shape: f32[2,8,32], index: 0, kind: input, shape index: {}]   ;;  %s1812_s1 = inlined_call_operand.vmem [shape: f32[32,384], index: 1, kind: input, shape index: {}]   ;;  %s1813_s2 = inlined_call_operand.vmem [shape: f32[128,32], index: 2, kind: input, shape index: {}]   ;;  %s1814_s3 = inlined_call_operand.vmem [shape: f32[1,32], index: 3, kind: input, shape index: {}]   ;;  %s1815_s4 = inlined_call_operand.hbm [shape: f32[2,8,32], index: 4, kind: output, shape index: {}]  }
   0x1   :  { %11 = vsyncpa [#allocation3 + $0x1], 0  ;;  %s1540_s15 = smov 0   ;;  %s1542_s16 = smov 0  }
   0x2   :  { %s1544_s17 = smov 0   ;;  %s1546_s18 = smov 0  }
   0x3 LB: > { %s1561_s19 = sadd.s32 4294967295, %s1506_s18   ;;  %s1196_s20 = sadd.s32 4294967294, %s1506_s18   ;;  %s1506_s18 = sphi %s1546_s18, %s1821_s18   ;;  %s1502_s17 = sphi %s1544_s17, %s1820_s17   ;;  %s1498_s16 = sphi %s1542_s16, %s1819_s16   ;;  %s1494_s15 = sphi %s1540_s15, %s1818_s15  }
   0x4   : > { %s1565_s21 = sadd.s32 1, %s1506_s18   ;;  %s113_s22 = sadd.s32 1, %s1502_s17 }
   0x5   : > { %s110_s23 = ssub.s32 %s1506_s18, %s1565_s21  ;;  %p123_p0 = scmp.ne.s32.totalorder %s1502_s17, %s1498_s16 }
   0x6   : > { %p111_p1 = scmp.eq.s32.totalorder %s110_s23, 0  ;;  %p124_p2 = scmp.eq.s32.totalorder %s1561_s19, 1 }
   0x7   : > { %p129_p3 = scmp.ne.s32.totalorder %s1498_s16, %s1494_s15  ;;  %p130_p4 = scmp.eq.s32.totalorder %s1196_s20, 1 }
   0x8   : > { %s1576_s24 = scalar_select %p111_p1, %s1502_s17, %s113_s22  }
   0x9   : > { %p1578_p5 = por %p124_p2, %p123_p0  ;;  %p1582_p6 = por %p130_p4, %p129_p3 }
   0xa   : > { %p1199_p7 = scmp.ge.s32.totalorder %s1506_s18, 1  ;;  %p164_p8 = scmp.lt.s32.totalorder %s1506_s18, 3 }
   0xc   : > { %p165_p9 = pnand %p1199_p7, %p164_p8 }
   0xd   : > { %v195_v0 = vld [vmem:[%s1812_s1 + $0x8] sm:$0xff] (!%p165_p9)  ;;  %v198_v1 = vld [vmem:[%s1812_s1 + $0x20] sm:$0xff] (!%p165_p9)  ;;  %p189_p10 = scmp.lt.s32.totalorder (!%p165_p9), %s1561_s19, 1  ;;  %v197_v4 = vld [vmem:[%s1812_s1 + $0x18] sm:$0xff] (!%p165_p9)  ;;  %v1508_v7 = vmov (!%p165_p9), 0.0   ;;  %vm206_vm0 = vcmask (!%p165_p9), 261120  }
   0xe   : > { %168 = sbr.rel (%p165_p9) target bundleno = 1923 (0x783), region = 36  ;;  %v194_v2 = vld [vmem:[%s1812_s1] sm:$0xff] (!%p165_p9)  ;;  %v1345_v3 = vpack.c.bf16 (!%p165_p9), %v198_v1, %v195_v0  ;;  %v201_v5 = vld [vmem:[%s1812_s1 + $0x38] sm:$0xff] (!%p165_p9)  ;;  %v204_v6 = vld [vmem:[%s1812_s1 + $0x50] sm:$0xff] (!%p165_p9)  ;;  %274 = vmatprep.mubr.f32.mxu1 (!%p165_p9), %v1508_v7  ;;  %1290 = vmatprep.subr.mxu0 (!%p165_p9), %v1508_v7  ;;  %v1509_v17 = vmov (!%p165_p9), 0.0|0.0   ;;  %vm1510_vm1 = vmmov (!%p165_p9), 0  }
   0xf   : > { %v1347_v8 = vpack.c.bf16 (!%p165_p9), %v197_v4, %v194_v2  ;;  %v1349_v9 = vpack.c.bf16 (!%p165_p9), %v204_v6, %v201_v5  ;;  %v200_v10 = vld [vmem:[%s1812_s1 + $0x30] sm:$0xff] (!%p165_p9)  ;;  %v203_v11 = vld [vmem:[%s1812_s1 + $0x48] sm:$0xff] (!%p165_p9)  ;;  %v202_v18 = vld [vmem:[%s1812_s1 + $0x40] sm:$0xff] (!%p165_p9)  ;;  %1292 = vmatprep.mubr.msk.f32.mxu0 (!%p165_p9), %vm1510_vm1, %v1508_v7  ;;  %s1511_s13 = smov (!%p165_p9), 96   ;;  %s1512_s14 = smov (!%p165_p9), 64   ;;  %vm428_vm2 = vcmask (!%p165_p9), 64512  }
  0x10   : > { %1346 = vmatprep.subr.bf16.mxu1 (!%p165_p9), %v1345_v3  ;;  %v1351_v12 = vpack.c.bf16 (!%p165_p9), %v203_v11, %v200_v10  ;;  %v196_v13 = vld [vmem:[%s1812_s1 + $0x10] sm:$0xff] (!%p165_p9)  ;;  %v199_v14 = vld [vmem:[%s1812_s1 + $0x28] sm:$0xff] (!%p165_p9)  ;;  %v205_v19 = vld [vmem:[%s1812_s1 + $0x58] sm:$0xff] (!%p165_p9)  ;;  %s1513_s20 = smov (!%p165_p9), 32   ;;  %vm1025_vm3 = vcmask (!%p165_p9), 523264   ;;  %vm1027_vm4 = vcmask (!%p165_p9), 785408  }
  0x11   : > { %1348 = vmatpush1.bf16.msra.mxu1 (!%p165_p9), %v1347_v8  ;;  %v1354_v16 = vpack.c.bf16 (!%p165_p9), %v199_v14, %v196_v13  ;;  %v1357_v20 = vpack.c.bf16 (!%p165_p9), %v205_v19, %v202_v18 }
  0x12   : > { %1350 = vmatprep.subr.bf16.mxu1 (!%p165_p9), %v1349_v9 }
  0x15   : > { %s190_s23 = scalar_select %p189_p10, %s1561_s19, 1  ;;  %1352 = vmatpush1.bf16.msra.mxu1 %v1351_v12 }
  0x16   : > { %1353 = vmatprep.subr.bf16.mxu1 %v1509_v17 }
  0x17   : > { %s1201_s27 = sshll.u32 %s190_s23, 3 }
  0x18   : > { %s192_s30 = scalar_lea.vmem %s1811_s0, %s1201_s27 }
  0x19   : > { %v193_v15 = vld [vmem:[%s192_s30] sm:$0xff] }
  0x1a   : > { %1202 = vmatmul.mubr.msk.f32.vlgmr.msra.gmra.mrb[0].mxu1 %vm206_vm0, %v193_v15 }
  0x1b   : > { %1355 = vmatpush3.bf16.msra.mxu1 %v1354_v16  ;;  %1267 = vmatprep.mubr.msk.f32.mxu1 %vm1510_vm1, %v1508_v7 }
  0x1c   : > { %1356 = vmatprep.subr.bf16.mxu1 %v1509_v17 }
  0x1f   : > { %1358 = vmatpush3.bf16.msra.mxu1 %v1357_v20 }
  0x20   : > { %1270 = vmatprep.subr.mxu1 %v1508_v7 }
  0x22   : > { %1268 = vmatmul.mubr.msk.f32.vlgmr.msra.gmra.mrb[2].mxu1 %vm206_vm0, %v193_v15 }
  0x23   : > { %1272 = vmatprep.mubr.msk.f32.mxu1 %vm1510_vm1, %v1508_v7 }
  0xed   : > { %v276_v21 = vpop.f32.mrb[0].mxu1 }
  0xee   : > { %v278_v22 = vpop.f32.mrb[1].mxu1 }
  0xef   : > { %515 = vrot.lane.b32.xlu1 %v278_v22, %s1511_s13  ;;  %1271 = vmatpush3.xpose.msk.msra.mxu1 %vm206_vm0, %v278_v22 }
  0xf0   : > { %1275 = vmatprep.subr.mxu1 %v1508_v7 }
  0xf2   : > { %1273 = vmatmul.mubr.msk.f32.vlgmr.msra.gmra.mrb[4].mxu1 %vm206_vm0, %v276_v21 }
  0xf3   : > { %513 = vrot.lane.b32.xlu1 %v276_v21, %s1511_s13  ;;  %1277 = vmatprep.mubr.msk.f32.mxu1 %vm1510_vm1, %v1508_v7 }
  0xf5   : > { %v1652_v23 = vpop.f32.mrb[2].mxu1 }
  0xf6   : > { %v1269_v24 = vpop.f32.mrb[3].mxu1  ;;  %1276 = vmatpush3.msra.mxu1 %v1652_v23 }
  0xf7   : > { %680 = vrot.lane.b32.xlu1 %v276_v21, %s1512_s14  ;;  %1280 = vmatprep.subr.mxu1 %v1508_v7  ;;  %v1031_v24 = vld [vmem:[%s1813_s2 + $0x10] sm:$0xff] }
  0xfb   : > { %848 = vrot.lane.b32.xlu1 %v278_v22, %s1513_s20 }
  0xff   : > { %846 = vrot.lane.b32.xlu1 %v276_v21, %s1513_s20 }
 0x161   : > { %v516_v34 = vpop.permute.xlu1 %515 }
 0x165   : > { %v514_v35 = vpop.permute.xlu1 %513 }
 0x169   : > { %v681_v36 = vpop.permute.xlu1 %680 }
 0x16d   : > { %v849_v39 = vpop.permute.xlu1 %848 }
 0x171   : > { %v847_v41 = vpop.permute.xlu1 %846 }
 0x1c5   : > { %v423_v25 = vpop.f32.mrb[4].mxu1 }
 0x1c6   : > { %v427_v26 = vmul.f32 0.17677669, %v423_v25  ;;  %v1274_v27 = vpop.f32.mrb[5].mxu1 }
 0x1c7   : > { %v1033_v27 = vld [vmem:[%s1813_s2 + $0x20] sm:$0xff] }
 0x1c8   : > { %v429_v28 = vsel %vm428_vm2, %v427_v26, -inf }
 0x1c9   : > { %430 = vmax.xlane.f32.xlu0 %v429_v28  ;;  %v1034_v28 = vld [vmem:[%s1813_s2 + $0x28] sm:$0xff] }
 0x256   : > { %v431_v29 = vpop.xlane.xlu0 %430 }
 0x257   : > { %v432_v30 = vsub.f32 %v427_v26, %v431_v29  ;;  %v1366_v29 = vpack.c.bf16 %v1034_v28, %v1033_v27 }
 0x259   : > { %v433_v31 = vmul.f32 1.442695, %v432_v30  ;;  %v1035_v30 = vld [vmem:[%s1813_s2 + $0x30] sm:$0xff] }
 0x25b   : > { %1428 = vpow2.f32 %v433_v31  ;;  %v1036_v31 = vld [vmem:[%s1813_s2 + $0x38] sm:$0xff] }
 0x265   : > { %v1429_v32 = vpop.eup %1428 }
 0x266   : > { %v435_v33 = vsel %vm428_vm2, %v1429_v32, 0.0 }
 0x267   : > { %436 = vadd.xlane.f32.xlu0 %v435_v33  ;;  %v1037_v33 = vld [vmem:[%s1813_s2 + $0x40] sm:$0xff] }
 0x27d   : > { %682 = vrot.lane.b32.xlu0 %v278_v22, %s1512_s14  ;;  %v1029_v22 = vld [vmem:[%s1813_s2] sm:$0xff] }
 0x2f4   : > { %v437_v37 = vpop.xlane.xlu0 %436 }
 0x2f5   : > { %1430 = vrcp.f32 %v437_v37  ;;  %v1040_v37 = vld [vmem:[%s1813_s2 + $0x58] sm:$0xff] }
 0x2f8   : > { %v683_v38 = vpop.permute.xlu0 %682 }
 0x2f9   : > { %1291 = vmatpush3.xpose.msk.msra.mxu0 %vm206_vm0, %v683_v38 }
 0x2fa   : > { %1300 = vmatprep.subr.mxu0 %v1508_v7 }
 0x2fc   : > { %1293 = vmatmul.mubr.msk.f32.vlgmr.msra.gmra.mrb[0].mxu0 %vm206_vm0, %v681_v36  ;;  %v1039_v36 = vld [vmem:[%s1813_s2 + $0x50] sm:$0xff] }
 0x2fd   : > { %1301 = vmatpush3.xpose.msk.msra.mxu0 %vm206_vm0, %v849_v39  ;;  %1302 = vmatprep.mubr.msk.f32.mxu0 %vm1510_vm1, %v1508_v7  ;;  %v1375_v38 = vpack.c.bf16 %v1040_v37, %v1039_v36  ;;  %v1041_v39 = vld [vmem:[%s1813_s2 + $0x60] sm:$0xff] }
 0x2fe   : > { %1359 = vmatprep.subr.bf16.mxu0 %v1509_v17 }
 0x2ff   : > { %v1431_v40 = vpop.eup %1430 }
 0x300   : > { %v439_v42 = vmul.f32 %v1431_v40, %v1429_v32  ;;  %1303 = vmatmul.mubr.msk.f32.vlgmr.msra.gmra.mrb[2].mxu0 %vm206_vm0, %v847_v41  ;;  %v1369_v32 = vpack.c.bf16 %v1036_v31, %v1035_v30  ;;  %v1042_v40 = vld [vmem:[%s1813_s2 + $0x68] sm:$0xff] }
 0x301   : > { %1342 = vmatprep.mubr.msk.f32.mxu0 %vm1510_vm1, %v1508_v7  ;;  %v1378_v41 = vpack.c.bf16 %v1042_v40, %v1041_v39 }
 0x302   : > { %1278 = vmatmul.mubr.msk.f32.vlgmr.msra.gmra.mrb[6].mxu1 %vm428_vm2, %v439_v42  ;;  %v1043_v42 = vld [vmem:[%s1813_s2 + $0x70] sm:$0xff] }
 0x303   : > { %1281 = vmatpush3.xpose.msk.msra.mxu1 %vm206_vm0, %v516_v34  ;;  %1282 = vmatprep.mubr.msk.f32.mxu1 %vm1510_vm1, %v1508_v7  ;;  %v1038_v34 = vld [vmem:[%s1813_s2 + $0x48] sm:$0xff] }
 0x304   : > { %1285 = vmatprep.subr.mxu1 %v1508_v7 }
 0x306   : > { %1283 = vmatmul.mubr.msk.f32.vlgmr.msra.gmra.mrb[8].mxu1 %vm206_vm0, %v514_v35  ;;  %v1372_v35 = vpack.c.bf16 %v1038_v34, %v1037_v33 }
 0x307   : > { %1287 = vmatprep.mubr.msk.f32.mxu1 %vm1510_vm1, %v1508_v7 }
 0x3cf   : > { %v754_v43 = vpop.f32.mrb[0].mxu0 }
 0x3d0   : > { %v758_v44 = vmul.f32 0.17677669, %v754_v43  ;;  %v1294_v45 = vpop.f32.mrb[1].mxu0  ;;  %v1044_v43 = vld [vmem:[%s1813_s2 + $0x78] sm:$0xff] }
 0x3d2   : > { %v759_v46 = vsel %vm428_vm2, %v758_v44, -inf }
 0x3d3   : > { %760 = vmax.xlane.f32.xlu0 %v759_v46  ;;  %v920_v47 = vpop.f32.mrb[2].mxu0 }
 0x3d4   : > { %v1304_v48 = vpop.f32.mrb[3].mxu0  ;;  %v924_v54 = vmul.f32 0.17677669, %v920_v47 }
 0x3d5   : > { %v1678_v49 = vpop.f32.mrb[6].mxu1 }
 0x3d6   : > { %v1279_v50 = vpop.f32.mrb[7].mxu1  ;;  %v925_v56 = vsel %vm428_vm2, %v924_v54, -inf }
 0x3d9   : > { %v587_v51 = vpop.f32.mrb[8].mxu1 }
 0x3da   : > { %v591_v52 = vmul.f32 0.17677669, %v587_v51  ;;  %v1284_v53 = vpop.f32.mrb[9].mxu1 }
 0x3dc   : > { %v592_v55 = vsel %vm428_vm2, %v591_v52, -inf }
 0x3dd   : > { %593 = vmax.xlane.f32.xlu1 %v592_v55 }
 0x3e1   : > { %926 = vmax.xlane.f32.xlu1 %v925_v56 }
 0x460   : > { %v761_v57 = vpop.xlane.xlu0 %760 }
 0x461   : > { %v762_v58 = vsub.f32 %v758_v44, %v761_v57  ;;  %v1381_v44 = vpack.c.bf16 %v1044_v43, %v1043_v42  ;;  %v1216_v57 = vld [vmem:[%s1814_s3] ss:$0 sm:$0xff] }
 0x463   : > { %v763_v59 = vmul.f32 1.442695, %v762_v58 }
 0x465   : > { %1432 = vpow2.f32 %v763_v59 }
 0x46a   : > { %v594_v60 = vpop.xlane.xlu1 %593 }
 0x46b   : > { %v595_v4 = vsub.f32 %v591_v52, %v594_v60 }
 0x46d   : > { %v596_v5 = vmul.f32 1.442695, %v595_v4 }
 0x46e   : > { %v927_v61 = vpop.xlane.xlu1 %926 }
 0x46f   : > { %v1433_v62 = vpop.eup %1432  ;;  %v928_v63 = vsub.f32 %v924_v54, %v927_v61 }
 0x470   : > { %v765_v0 = vsel %vm428_vm2, %v1433_v62, 0.0 }
 0x471   : > { %v929_v1 = vmul.f32 1.442695, %v928_v63  ;;  %766 = vadd.xlane.f32.xlu0 %v765_v0 }
 0x473   : > { %1434 = vpow2.f32 %v929_v1 }
 0x474   : > { %1436 = vpow2.f32 %v596_v5 }
 0x47d   : > { %v1435_v2 = vpop.eup %1434 }
 0x47e   : > { %v931_v3 = vsel %vm428_vm2, %v1435_v2, 0.0  ;;  %v1437_v6 = vpop.eup %1436 }
 0x47f   : > { %932 = vadd.xlane.f32.xlu1 %v931_v3  ;;  %v598_v8 = vsel %vm428_vm2, %v1437_v6, 0.0 }
 0x487   : > { %604 = vrot.lane.b32.xlu0 %v1652_v23, %s1511_s13 }
 0x490   : > { %770 = vrot.lane.b32.xlu1 %v1652_v23, %s1512_s14 }
 0x4b4   : > { %599 = vadd.xlane.f32.xlu1 %v598_v8 }
 0x4c5   : > { %936 = vrot.lane.b32.xlu1 %v1652_v23, %s1513_s20  ;;  %v1030_v23 = vld [vmem:[%s1813_s2 + $0x8] sm:$0xff] }
 0x4c6   : > { %v1360_v25 = vpack.c.bf16 %v1030_v23, %v1029_v22 }
 0x4c8   : > { %1361 = vmatpush3.bf16.msra.mxu0 %v1360_v25 }
 0x4c9   : > { %1362 = vmatprep.subr.bf16.mxu0 %v1509_v17 }
 0x4fe   : > { %v767_v9 = vpop.xlane.xlu0 %766 }
 0x502   : > { %v605_v10 = vpop.permute.xlu0 %604 }
 0x503   : > { %1286 = vmatpush3.msra.mxu1 %v605_v10 }
 0x504   : > { %1295 = vmatprep.subr.mxu1 %v1508_v7 }
 0x50c   : > { %v933_v11 = vpop.xlane.xlu1 %932 }
 0x510   : > { %v771_v12 = vpop.permute.xlu1 %770 }
 0x541   : > { %v600_v13 = vpop.xlane.xlu1 %599 }
 0x542   : > { %1438 = vrcp.f32 %v600_v13 }
 0x543   : > { %1440 = vrcp.f32 %v767_v9 }
 0x544   : > { %1442 = vrcp.f32 %v933_v11 }
 0x545   : > { %v937_v20 = vpop.permute.xlu1 %936 }
 0x54c   : > { %v1439_v14 = vpop.eup %1438 }
 0x54d   : > { %v602_v15 = vmul.f32 %v1439_v14, %v1437_v6  ;;  %v1441_v16 = vpop.eup %1440 }
 0x54e   : > { %v769_v18 = vmul.f32 %v1441_v16, %v1433_v62  ;;  %v1443_v19 = vpop.eup %1442 }
 0x54f   : > { %1288 = vmatmul.mubr.msk.f32.vlgmr.msra.gmra.mrb[10].mxu1 %vm428_vm2, %v602_v15  ;;  %v935_v21 = vmul.f32 %v1443_v19, %v1435_v2 }
 0x550   : > { %1296 = vmatpush3.msra.mxu1 %v771_v12  ;;  %1297 = vmatprep.mubr.msk.f32.mxu1 %vm1510_vm1, %v1508_v7 }
 0x551   : > { %1305 = vmatprep.subr.mxu1 %v1508_v7 }
 0x553   : > { %1298 = vmatmul.mubr.msk.f32.vlgmr.msra.gmra.mrb[12].mxu1 %vm428_vm2, %v769_v18 }
 0x554   : > { %1306 = vmatpush3.msra.mxu1 %v937_v20  ;;  %1307 = vmatprep.mubr.msk.f32.mxu1 %vm1510_vm1, %v1508_v7  ;;  %v1032_v7 = vld [vmem:[%s1813_s2 + $0x18] sm:$0xff] }
 0x555   : > { %v1363_v26 = vpack.c.bf16 %v1032_v7, %v1031_v24 }
 0x557   : > { %1308 = vmatmul.mubr.msk.f32.vlgmr.msra.gmra.mrb[14].mxu1 %vm428_vm2, %v935_v21  ;;  %1364 = vmatpush3.bf16.msra.mxu0 %v1363_v26 }
 0x558   : > { %1365 = vmatprep.subr.bf16.mxu0 %v1509_v17 }
 0x55b   : > { %1367 = vmatpush3.bf16.msra.mxu0 %v1366_v29 }
 0x55c   : > { %1368 = vmatprep.subr.bf16.mxu0 %v1509_v17 }
 0x55f   : > { %1370 = vmatpush3.bf16.msra.mxu0 %v1369_v32 }
 0x560   : > { %1371 = vmatprep.subr.bf16.mxu0 %v1509_v17 }
 0x563   : > { %1373 = vmatpush3.bf16.msra.mxu0 %v1372_v35 }
 0x564   : > { %1374 = vmatprep.subr.bf16.mxu0 %v1509_v17 }
 0x567   : > { %1376 = vmatpush3.bf16.msra.mxu0 %v1375_v38 }
 0x568   : > { %1377 = vmatprep.subr.bf16.mxu0 %v1509_v17 }
 0x56b   : > { %1379 = vmatpush3.bf16.msra.mxu0 %v1378_v41 }
 0x56c   : > { %1380 = vmatprep.subr.bf16.mxu0 %v1509_v17 }
 0x56f   : > { %1382 = vmatpush3.bf16.msra.mxu0 %v1381_v44 }
 0x622   : > { %v676_v45 = vpop.f32.mrb[10].mxu1 }
 0x623   : > { %1013 = vrot.lane.b32.xlu0 %v676_v45, %s1513_s20  ;;  %v1289_v46 = vpop.f32.mrb[11].mxu1  ;;  %s186_s20 = sand.u32 1, %s1498_s16  }
 0x624   : > { %s1124_s10 = scalar_lea.sflag [#allocation3], %s186_s20 }
 0x626   : > { %v842_v47 = vpop.f32.mrb[12].mxu1 }
 0x627   : > { %1017 = vrot.lane.b32.xlu1 %v842_v47, %s1512_s14  ;;  %v1299_v48 = vpop.f32.mrb[13].mxu1  ;;  %s1200_s14 = sshll.u32 %s186_s20, 3 }
 0x628   : > { %s188_s5 = scalar_lea.vmem [#allocation2], %s1200_s14 }
 0x629   : > { %s1137_s6 = sshll.u32 %s188_s5, 4  ;;  %s1770_s6 = int_to_ptr.vmem [resolvable:$true] %s1137_s6 }
 0x62a   : > { %v1008_v17 = vpop.f32.mrb[14].mxu1  ;;  %s1444_s11 = scalar_lea.vmem %s1770_s6, 128 }
 0x62b   : > { %1021 = vrot.lane.b32.xlu0 %v1008_v17, %s1511_s13  ;;  %v1309_v50 = vpop.f32.mrb[15].mxu1  ;;  %s1218_s13 = sshll.u32 %s1561_s19, 7  ;;  %p1445_p11 = scmp.ne.s32.totalorder %s1770_s6, %s1444_s11 }
 0x62c   : > { %s1768_s9 = scalar_lea.hbm %s1815_s4, %s1218_s13  ;;  %s1514_s19 = smov [#allocation2]  }
 0x62d   : > { %p1446_p12 = pnand %p1445_p11, %p1578_p5  ;;  %s1448_s12 = sshll.u32 %s1514_s19, 4  ;;  %s1449_s12 = int_to_ptr.vmem [resolvable:$false] %s1448_s12 }
 0x62e   : > { %s1450_s22 = scalar_lea.vmem %s1449_s12, 256  ;;  %p1451_p0 = scmp.lt.s32.totalorder %s1770_s6, %s1449_s12 }
 0x62f   : > { %p1447_p13 = pneg %p1446_p12  ;;  %p1452_p1 = scmp.lt.s32.totalorder %s1450_s22, %s1444_s11 }
 0x631   : > { %p1453_p2 = por %p1452_p1, %p1451_p0 }
 0x633   : > { %p1454_p3 = pnand %p1453_p2, %p1447_p13 }
 0x695   : > { %v1014_v51 = vpop.permute.xlu0 %1013 }
 0x696   : > { %v1024_v53 = vsel %vm206_vm0, %v1678_v49, %v1014_v51 }
 0x699   : > { %v1018_v52 = vpop.permute.xlu1 %1017 }
 0x69a   : > { %v1026_v54 = vsel %vm1025_vm3, %v1024_v53, %v1018_v52 }
 0x69d   : > { %v1022_v55 = vpop.permute.xlu0 %1021 }
 0x69e   : > { %v1028_v56 = vsel %vm1027_vm4, %v1026_v54, %v1022_v55 }
 0x69f   : > { %1343 = vmatmul.mubr.f32.vlgmr.msra.gmra.mrb[4].mxu0 %v1028_v56 }
 0x772   : > { %v1118_v58 = vpop.f32.mrb[4].mxu0 }
 0x773   : > { %v1119_v59 = vadd.f32 %v1216_v57, %v1118_v58  ;;  %v1344_v60 = vpop.f32.mrb[5].mxu0 }
 0x775   : > { %1122 = vst.msk [vmem:[%s188_s5] sm:$0xff] %vm206_vm0, %v1119_v59 }
 0x776   : > { %1457 = shalt.err (!%p1454_p3)
}
 0x777   : > { %s1458_s23 = scalar_lea.hbm %s1768_s9, 128  ;;  %s1462_s20 = scalar_lea.hbm %s1815_s4, 256 }
 0x778   : > { %p1459_p4 = scmp.ne.s32.totalorder %s1768_s9, %s1458_s23  ;;  %p1463_p9 = scmp.lt.u32.totalorder %s1768_s9, %s1815_s4 }
 0x779   : > { %p1464_p10 = scmp.lt.u32.totalorder %s1462_s20, %s1458_s23  ;;  %p1466_p12 = scmp.lt.u32.totalorder %s1458_s23, %s1768_s9 }
 0x77a   : > { %p1460_p7 = pnand %p1459_p4, %p1578_p5 }
 0x77b   : > { %p1465_p11 = por %p1464_p10, %p1463_p9 }
 0x77c   : > { %p1461_p8 = pneg %p1460_p7 }
 0x77d   : > { %p1467_p13 = por %p1466_p12, %p1465_p11 }
 0x77f   : > { %p1468_p0 = pnand %p1467_p13, %p1461_p8 }
 0x781   : > { %1471 = shalt.err (!%p1468_p0)
}
 0x782   : > { %1383 = dma.vmem_to_hbm [thread:$0]  (%p1578_p5), %s1770_s6, 128, %s1768_s9, %s1124_s10  }
 0x783 PF: > { %p1389_p1 = scmp.ge.s32.totalorder %s1506_s18, 2  ;;  %s1149_s30 = sand.u32 1, %s1494_s15  }
 0x784   : > { %s1150_s13 = scalar_lea.sflag [#allocation3], %s1149_s30 }
 0x785   : > { %p1386_p2 = pnand %p1389_p1, %p1582_p6 }
 0x787   : > { %1489 = dma.done.wait (!%p1386_p2), %s1150_s13, 128  }
 0x788   : > { %1491 = vsyncadd (!%p1386_p2), %s1150_s13, 4294967168  ;;  %p14_p3 = scmp.ge.s32.totalorder %s1565_s21, 4   ;;  %s1818_s15 = smov %s1498_s16 }
 0x789   : > { %s1819_s16 = smov %s1502_s17  ;;  %s1820_s17 = smov %s1576_s24 }
 0x78a   : > { %s1821_s18 = smov %s1565_s21  ;;  %16 = sbr.rel (!%p14_p3) target bundleno = 3 (0x3), region = 71 }
 0x791   :  { %1155 = vsyncpa [#allocation3], 1 }
 0x792   :  { %1157 = vsyncpa [#allocation3 + $0x1], 1 }

</bundles_post_ra>
